<compile_context>
chip_gen: v6e
topology: v6e:2x2x1
jax: 0.10.0
libtpu: 0.0.40
codegen_flags: <defaults>
</compile_context>

<pallas_src>
import functools

import jax
import jax.numpy as jnp
from jax.experimental import pallas as pl
from jax.experimental.pallas import tpu as pltpu


# ----------------------------------------------------------------------------
# static layout of the packed weight slab
# ----------------------------------------------------------------------------
def _layout(config, latent_dim, sublane=16):
    """(row_offset, fan_in, fan_out) per layer block; 16-row aligned for bf16."""
    dims = [
        (config[0], config[1]),          # enc 1  (ReLU)
        (config[1], config[2]),          # enc 2  (ReLU)
        (config[-1], 2 * latent_dim),    # fused mu|logvar heads
        (latent_dim, config[1]),         # dec 1  (ReLU)
        (config[1], config[0]),          # dec 2  (Sigmoid)
    ]
    layout, row = [], 0
    for fi, fo in dims:
        layout.append((row, fi, fo))
        row += -(-fi // sublane) * sublane
    width = max(fo for _, fo in dims)
    return tuple(layout), row, width


# ----------------------------------------------------------------------------
# parameter packing: 5 (weight, bias) layers -> one bf16 weight slab + f32 biases
# ----------------------------------------------------------------------------
def pack_params(params, config, latent_dim):
    # Fuse mu/logvar heads into one (latent_in, 2*latent) layer.
    w_muvar = jnp.concatenate([params["wmu"], params["wvar"]], axis=1)
    b_muvar = jnp.concatenate([params["bmu"], params["bvar"]], axis=1)

    weights = [params["w1"], params["w2"], w_muvar, params["wd1"], params["wd2"]]
    biases = [params["b1"], params["b2"], b_muvar, params["bd1"], params["bd2"]]

    layout, n_rows, width = _layout(config, latent_dim)

    W_pack = jnp.zeros((n_rows, width), jnp.float32)
    for (row, fi, fo), w in zip(layout, weights):
        W_pack = W_pack.at[row:row + fi, :fo].set(w)
    W_pack = W_pack.astype(jnp.bfloat16)          # native MXU input, resident

    B_pack = jnp.zeros((8, width), jnp.float32)   # biases stay f32 (tiny)
    for j, b in enumerate(biases):
        B_pack = B_pack.at[j, : b.shape[1]].set(b[0])

    return W_pack, B_pack


# ----------------------------------------------------------------------------
# kernel
# ----------------------------------------------------------------------------
def make_kernel(layout, latent_dim, c0, out_pad):
    (r1, i1, o1), (r2, i2, o2), (r3, i3, o3), (r4, i4, o4), (r5, i5, o5) = layout
    total = c0 + 3 * latent_dim
    f32, bf16 = jnp.float32, jnp.bfloat16

    def kernel(x_ref, eps_ref, w_ref, b_ref, out_ref):
        def dense(a_bf16, r, fi, fo, j):
            # static slices of the packed slabs (free views); bf16 MXU, f32 acc
            w = w_ref[r:r + fi, 0:fo]
            b = b_ref[j:j + 1, 0:fo]
            return jnp.dot(a_bf16, w, preferred_element_type=f32) + b

        x = x_ref[...]                                   # bf16 from HBM

        # encoder: Linear+ReLU, Linear+ReLU (elementwise math kept in f32)
        h = jnp.maximum(dense(x, r1, i1, o1, 0), 0.0)
        h = jnp.maximum(dense(h.astype(bf16), r2, i2, o2, 1), 0.0)

        # fused latent heads: one dot -> [mu | logvar]
        y = dense(h.astype(bf16), r3, i3, o3, 2)
        mu = y[:, :latent_dim]
        logvar = y[:, latent_dim:2 * latent_dim]

        # reparameterization: z = eps * exp(0.5 * logVar) + mu   (exp on EUP)
        z = eps_ref[...].astype(f32) * jnp.exp(0.5 * logvar) + mu

        # decoder: Linear+ReLU, Linear+Sigmoid
        d = jnp.maximum(dense(z.astype(bf16), r4, i4, o4, 3), 0.0)
        o = jax.nn.sigmoid(dense(d.astype(bf16), r5, i5, o5, 4))

        # lane-dense output slab via direct static sub-slice stores (no concat)
        out_ref[:, 0:c0] = o.astype(out_ref.dtype)
        out_ref[:, c0:c0 + latent_dim] = z.astype(out_ref.dtype)
        out_ref[:, c0 + latent_dim:c0 + 2 * latent_dim] = mu.astype(out_ref.dtype)
        out_ref[:, c0 + 2 * latent_dim:total] = logvar.astype(out_ref.dtype)
        if out_pad > total:  # keep pad lanes deterministic; wrapper discards them
            out_ref[:, total:out_pad] = jnp.zeros(
                (out_ref.shape[0], out_pad - total), out_ref.dtype)

    return kernel


# ----------------------------------------------------------------------------
# wrapper
# ----------------------------------------------------------------------------
@functools.partial(jax.jit, static_argnums=(4, 5, 6))
def _vae_forward_impl(x, eps, W_pack, B_pack, config, latent_dim, block_rows):
    B, in_dim = x.shape
    c0 = config[0]
    total = c0 + 3 * latent_dim
    out_pad = -(-total // 128) * 128                     # lane-dense output width

    # Pad the batch to a multiple of the row tile (keeps sweep-optimal tiles and
    # megacore sharding even for awkward batch sizes); stream operands as bf16.
    B_pad = -(-B // block_rows) * block_rows
    if B_pad != B:
        x = jnp.pad(x, ((0, B_pad - B), (0, 0)))
        eps = jnp.pad(eps, ((0, B_pad - B), (0, 0)))
    x = x.astype(jnp.bfloat16)
    eps = eps.astype(jnp.bfloat16)

    layout, _, _ = _layout(config, latent_dim)

    flops = 2 * B_pad * sum(fi * fo for (_, fi, fo) in layout)
    transcendentals = B_pad * (latent_dim + c0)          # exp + sigmoid
    bytes_accessed = (2 * (x.size + eps.size + W_pack.size + B_pad * out_pad)
                      + 4 * B_pack.size)

    kernel = make_kernel(layout, latent_dim, c0, out_pad)

    slab = pl.pallas_call(
        kernel,
        out_shape=jax.ShapeDtypeStruct((B_pad, out_pad), jnp.bfloat16),
        grid=(B_pad // block_rows,),
        in_specs=[
            pl.BlockSpec((block_rows, in_dim), lambda i: (i, 0)),
            pl.BlockSpec((block_rows, latent_dim), lambda i: (i, 0)),
            pl.BlockSpec(W_pack.shape, lambda i: (0, 0)),   # weights resident
            pl.BlockSpec(B_pack.shape, lambda i: (0, 0)),   # biases resident
        ],
        out_specs=pl.BlockSpec((block_rows, out_pad), lambda i: (i, 0)),
        compiler_params=pltpu.CompilerParams(
            dimension_semantics=("parallel",),              # shard across v7x TCs
        ),
        cost_estimate=pl.CostEstimate(
            flops=flops,
            transcendentals=transcendentals,
            bytes_accessed=bytes_accessed,
        ),
    )(x, eps, W_pack, B_pack)

    slab = slab.astype(jnp.float32)
    out = slab[:B, :c0]
    z = slab[:B, c0:c0 + latent_dim]
    mu = slab[:B, c0 + latent_dim:c0 + 2 * latent_dim]
    logvar = slab[:B, c0 + 2 * latent_dim:c0 + 3 * latent_dim]
    return out, z, mu, logvar


def _choose_block_rows(batch):
    """Row-tile heuristic: large tiles for HBM roofline, >=2 grid steps so the
    'parallel' axis shards across both v7x TensorCores, multiple of 16 (bf16
    sublane tile), capped at 1024 rows."""
    if batch <= 16:
        return batch                       # full-array block (tiling-rule exempt)
    target = min(1024, (batch + 1) // 2)   # at least 2 blocks, at most 1024 rows
    return -(-target // 16) * 16


def vae_forward(x, eps, params, config, latent_dim, block_rows=None):
    """Full VAE forward pass: returns (reconstruction, z, mu, logVar)."""
    assert latent_dim == config[-1], (
        "original forward() only type-checks when latent_dim == config[-1]")
    if block_rows is None:
        block_rows = _choose_block_rows(x.shape[0])
    W_pack, B_pack = pack_params(params, config, latent_dim)
    return _vae_forward_impl(x, eps, W_pack, B_pack,
                             tuple(config), int(latent_dim), int(block_rows))


# ----------------------------------------------------------------------------
# init + reference
# ----------------------------------------------------------------------------
def init_params(key, config, latent_dim):
    """PyTorch-style init (uniform +/- 1/sqrt(fan_in)); W stored (in, out)."""
    params = {}

    def linear(key, fan_in, fan_out):
        kw, kb = jax.random.split(key)
        bound = 1.0 / jnp.sqrt(jnp.float32(fan_in))
        w = jax.random.uniform(kw, (fan_in, fan_out), jnp.float32, -bound, bound)
        b = jax.random.uniform(kb, (1, fan_out), jnp.float32, -bound, bound)
        return w, b

    keys = jax.random.split(key, 6)
    params["w1"], params["b1"] = linear(keys[0], config[0], config[1])
    params["w2"], params["b2"] = linear(keys[1], config[1], config[2])
    params["wmu"], params["bmu"] = linear(keys[2], config[-1], latent_dim)
    params["wvar"], params["bvar"] = linear(keys[3], config[-1], latent_dim)
    params["wd1"], params["bd1"] = linear(keys[4], config[2], config[1])
    params["wd2"], params["bd2"] = linear(keys[5], config[1], config[0])
    # TODO(synk): the PyTorch module also builds self.decoder_input, but it is
    # never used in forward()/decode(), so it is intentionally not implemented.
    return params


def vae_reference(x, eps, p, io_dtype=jnp.float32):
    """Plain-JAX reference. io_dtype simulates the kernel's HBM storage dtype
    (x/eps/weights/outputs streamed as bf16, all math in f32)."""
    f32 = jnp.float32
    q = lambda a: a.astype(io_dtype)

    def dense(a, w, b):
        return jnp.dot(q(a), q(w), preferred_element_type=f32) + b.astype(f32)

    h = jnp.maximum(dense(x, p["w1"], p["b1"]), 0.0)
    h = jnp.maximum(dense(h, p["w2"], p["b2"]), 0.0)
    mu = dense(h, p["wmu"], p["bmu"])
    logvar = dense(h, p["wvar"], p["bvar"])
    z = q(eps).astype(f32) * jnp.exp(0.5 * logvar) + mu
    d = jnp.maximum(dense(z, p["wd1"], p["bd1"]), 0.0)
    o = jax.nn.sigmoid(dense(d, p["wd2"], p["bd2"]))
    return tuple(q(t).astype(f32) for t in (o, z, mu, logvar))


if __name__ == "__main__":
    config = [64, 32, 16]
    latent_dim = 16   # must equal config[-1] for the original forward()
    batch = 8

    key = jax.random.PRNGKey(0)
    k_x, k_eps, k_params = jax.random.split(key, 3)

    x = jax.random.normal(k_x, (batch, config[0]), jnp.float32)
    # eps plays the role of torch.randn_like(std): standard normal noise.
    eps = jax.random.normal(k_eps, (batch, latent_dim), jnp.float32)
    params = init_params(k_params, config, latent_dim)

    outs = jax.block_until_ready(
        vae_forward(x, eps, params, config, latent_dim))

    refs_bf16 = vae_reference(x, eps, params, io_dtype=jnp.bfloat16)
    refs_f32 = vae_reference(x, eps, params, io_dtype=jnp.float32)
    for name, got, rb, rf in zip(("recon", "z", "mu", "logVar"),
                                 outs, refs_bf16, refs_f32):
        assert jnp.allclose(got, rb, atol=1e-2, rtol=1e-2), name     # bf16-matched
        assert jnp.allclose(got, rf, atol=5e-2, rtol=5e-2), name     # f32 spec

    print("KERNEL_OK")
</pallas_src>

<mosaic_0001>
module attributes {stable_mosaic.version = 11 : i64} {
  func.func @kernel(%arg0: i32, %arg1: memref<8x64xbf16, #tpu.memory_space<vmem>>, %arg2: memref<8x16xbf16, #tpu.memory_space<vmem>>, %arg3: memref<160x64xbf16, #tpu.memory_space<vmem>>, %arg4: memref<8x64xf32, #tpu.memory_space<vmem>>, %arg5: memref<8x128xbf16, #tpu.memory_space<vmem>>) attributes {dimension_semantics = [#tpu.dimension_semantics<parallel>], iteration_bounds = array<i64: 1>, scalar_prefetch = 0 : i64, scratch_operands = 0 : i64, tpu.core_type = #tpu.core_type<tc>, window_params = [{transform_indices = @transform_0, window_bounds = array<i64: 8, 64>}, {transform_indices = @transform_1, window_bounds = array<i64: 8, 16>}, {pipeline_mode = #tpu.pipeline_mode<synchronous>, transform_indices = @transform_2, window_bounds = array<i64: 160, 64>}, {pipeline_mode = #tpu.pipeline_mode<synchronous>, transform_indices = @transform_3, window_bounds = array<i64: 8, 64>}, {transform_indices = @transform_4, window_bounds = array<i64: 8, 128>}]} {
    %c0 = arith.constant 0 : index
    %c0_0 = arith.constant 0 : index
    %0 = vector.load %arg1[%c0, %c0_0] : memref<8x64xbf16, #tpu.memory_space<vmem>>, vector<8x64xbf16>
    %c0_1 = arith.constant 0 : index
    %c0_2 = arith.constant 0 : index
    %1 = vector.load %arg3[%c0_1, %c0_2] : memref<160x64xbf16, #tpu.memory_space<vmem>>, vector<64x32xbf16>
    %c0_3 = arith.constant 0 : index
    %c0_4 = arith.constant 0 : index
    %2 = vector.load %arg4[%c0_3, %c0_4] : memref<8x64xf32, #tpu.memory_space<vmem>>, vector<1x32xf32>
    %cst = arith.constant dense<0.000000e+00> : vector<8x32xf32>
    %3 = tpu.matmul %0, %1, %cst {dimension_numbers = #tpu.dot_dimension_numbers<[1], [0], [0], [1], [0, 0, 1, 1], [], []>} : vector<8x64xbf16>, vector<64x32xbf16>, vector<8x32xf32> -> vector<8x32xf32>
    %4 = vector.broadcast %2 : vector<1x32xf32> to vector<8x32xf32>
    %5 = arith.addf %3, %4 : vector<8x32xf32>
    %cst_5 = arith.constant 0.000000e+00 : f32
    %6 = vector.broadcast %cst_5 : f32 to vector<8x32xf32>
    %7 = arith.maximumf %5, %6 : vector<8x32xf32>
    %8 = arith.truncf %7 : vector<8x32xf32> to vector<8x32xbf16>
    %c64 = arith.constant 64 : index
    %c0_6 = arith.constant 0 : index
    %9 = vector.load %arg3[%c64, %c0_6] : memref<160x64xbf16, #tpu.memory_space<vmem>>, vector<32x16xbf16>
    %c1 = arith.constant 1 : index
    %c0_7 = arith.constant 0 : index
    %10 = vector.load %arg4[%c1, %c0_7] : memref<8x64xf32, #tpu.memory_space<vmem>>, vector<1x16xf32>
    %cst_8 = arith.constant dense<0.000000e+00> : vector<8x16xf32>
    %11 = tpu.matmul %8, %9, %cst_8 {dimension_numbers = #tpu.dot_dimension_numbers<[1], [0], [0], [1], [0, 0, 1, 1], [], []>} : vector<8x32xbf16>, vector<32x16xbf16>, vector<8x16xf32> -> vector<8x16xf32>
    %12 = vector.broadcast %10 : vector<1x16xf32> to vector<8x16xf32>
    %13 = arith.addf %11, %12 : vector<8x16xf32>
    %cst_9 = arith.constant 0.000000e+00 : f32
    %14 = vector.broadcast %cst_9 : f32 to vector<8x16xf32>
    %15 = arith.maximumf %13, %14 : vector<8x16xf32>
    %16 = arith.truncf %15 : vector<8x16xf32> to vector<8x16xbf16>
    %c96 = arith.constant 96 : index
    %c0_10 = arith.constant 0 : index
    %17 = vector.load %arg3[%c96, %c0_10] : memref<160x64xbf16, #tpu.memory_space<vmem>>, vector<16x32xbf16>
    %c2 = arith.constant 2 : index
    %c0_11 = arith.constant 0 : index
    %18 = vector.load %arg4[%c2, %c0_11] : memref<8x64xf32, #tpu.memory_space<vmem>>, vector<1x32xf32>
    %cst_12 = arith.constant dense<0.000000e+00> : vector<8x32xf32>
    %19 = tpu.matmul %16, %17, %cst_12 {dimension_numbers = #tpu.dot_dimension_numbers<[1], [0], [0], [1], [0, 0, 1, 1], [], []>} : vector<8x16xbf16>, vector<16x32xbf16>, vector<8x32xf32> -> vector<8x32xf32>
    %20 = vector.broadcast %18 : vector<1x32xf32> to vector<8x32xf32>
    %21 = arith.addf %19, %20 : vector<8x32xf32>
    %22 = vector.extract_strided_slice %21 {offsets = [0, 0], sizes = [8, 16], strides = [1, 1]} : vector<8x32xf32> to vector<8x16xf32>
    %23 = vector.extract_strided_slice %21 {offsets = [0, 16], sizes = [8, 16], strides = [1, 1]} : vector<8x32xf32> to vector<8x16xf32>
    %c0_13 = arith.constant 0 : index
    %c0_14 = arith.constant 0 : index
    %24 = vector.load %arg2[%c0_13, %c0_14] : memref<8x16xbf16, #tpu.memory_space<vmem>>, vector<8x16xbf16>
    %25 = arith.extf %24 : vector<8x16xbf16> to vector<8x16xf32>
    %cst_15 = arith.constant 5.000000e-01 : f32
    %26 = vector.broadcast %cst_15 : f32 to vector<8x16xf32>
    %27 = arith.mulf %26, %23 : vector<8x16xf32>
    %28 = math.exp %27 : vector<8x16xf32>
    %29 = arith.mulf %25, %28 : vector<8x16xf32>
    %30 = arith.addf %29, %22 : vector<8x16xf32>
    %31 = arith.truncf %30 : vector<8x16xf32> to vector<8x16xbf16>
    %c112 = arith.constant 112 : index
    %c0_16 = arith.constant 0 : index
    %32 = vector.load %arg3[%c112, %c0_16] : memref<160x64xbf16, #tpu.memory_space<vmem>>, vector<16x32xbf16>
    %c3 = arith.constant 3 : index
    %c0_17 = arith.constant 0 : index
    %33 = vector.load %arg4[%c3, %c0_17] : memref<8x64xf32, #tpu.memory_space<vmem>>, vector<1x32xf32>
    %cst_18 = arith.constant dense<0.000000e+00> : vector<8x32xf32>
    %34 = tpu.matmul %31, %32, %cst_18 {dimension_numbers = #tpu.dot_dimension_numbers<[1], [0], [0], [1], [0, 0, 1, 1], [], []>} : vector<8x16xbf16>, vector<16x32xbf16>, vector<8x32xf32> -> vector<8x32xf32>
    %35 = vector.broadcast %33 : vector<1x32xf32> to vector<8x32xf32>
    %36 = arith.addf %34, %35 : vector<8x32xf32>
    %cst_19 = arith.constant 0.000000e+00 : f32
    %37 = vector.broadcast %cst_19 : f32 to vector<8x32xf32>
    %38 = arith.maximumf %36, %37 : vector<8x32xf32>
    %39 = arith.truncf %38 : vector<8x32xf32> to vector<8x32xbf16>
    %c128 = arith.constant 128 : index
    %c0_20 = arith.constant 0 : index
    %40 = vector.load %arg3[%c128, %c0_20] : memref<160x64xbf16, #tpu.memory_space<vmem>>, vector<32x64xbf16>
    %c4 = arith.constant 4 : index
    %c0_21 = arith.constant 0 : index
    %41 = vector.load %arg4[%c4, %c0_21] : memref<8x64xf32, #tpu.memory_space<vmem>>, vector<1x64xf32>
    %cst_22 = arith.constant dense<0.000000e+00> : vector<8x64xf32>
    %42 = tpu.matmul %39, %40, %cst_22 {dimension_numbers = #tpu.dot_dimension_numbers<[1], [0], [0], [1], [0, 0, 1, 1], [], []>} : vector<8x32xbf16>, vector<32x64xbf16>, vector<8x64xf32> -> vector<8x64xf32>
    %43 = vector.broadcast %41 : vector<1x64xf32> to vector<8x64xf32>
    %44 = arith.addf %42, %43 : vector<8x64xf32>
    %45 = arith.negf %44 : vector<8x64xf32>
    %46 = math.exp %45 : vector<8x64xf32>
    %cst_23 = arith.constant 1.000000e+00 : f32
    %47 = vector.broadcast %cst_23 : f32 to vector<8x64xf32>
    %48 = arith.addf %47, %46 : vector<8x64xf32>
    %49 = arith.divf %47, %48 : vector<8x64xf32>
    %50 = arith.truncf %49 : vector<8x64xf32> to vector<8x64xbf16>
    %c0_24 = arith.constant 0 : index
    %c0_25 = arith.constant 0 : index
    %51 = vector.load %arg5[%c0_24, %c0_25] : memref<8x128xbf16, #tpu.memory_space<vmem>>, vector<8x64xbf16>
    tpu.vector_store %arg5[%c0_24, %c0_25], %50 {strides = array<i32>} : memref<8x128xbf16, #tpu.memory_space<vmem>>, vector<8x64xbf16>,
    %52 = arith.truncf %30 : vector<8x16xf32> to vector<8x16xbf16>
    %c0_26 = arith.constant 0 : index
    %c64_27 = arith.constant 64 : index
    %53 = vector.load %arg5[%c0_26, %c64_27] : memref<8x128xbf16, #tpu.memory_space<vmem>>, vector<8x16xbf16>
    tpu.vector_store %arg5[%c0_26, %c64_27], %52 {strides = array<i32>} : memref<8x128xbf16, #tpu.memory_space<vmem>>, vector<8x16xbf16>,
    %54 = arith.truncf %22 : vector<8x16xf32> to vector<8x16xbf16>
    %c0_28 = arith.constant 0 : index
    %c80 = arith.constant 80 : index
    %55 = vector.load %arg5[%c0_28, %c80] : memref<8x128xbf16, #tpu.memory_space<vmem>>, vector<8x16xbf16>
    tpu.vector_store %arg5[%c0_28, %c80], %54 {strides = array<i32>} : memref<8x128xbf16, #tpu.memory_space<vmem>>, vector<8x16xbf16>,
    %56 = arith.truncf %23 : vector<8x16xf32> to vector<8x16xbf16>
    %c0_29 = arith.constant 0 : index
    %c96_30 = arith.constant 96 : index
    %57 = vector.load %arg5[%c0_29, %c96_30] : memref<8x128xbf16, #tpu.memory_space<vmem>>, vector<8x16xbf16>
    tpu.vector_store %arg5[%c0_29, %c96_30], %56 {strides = array<i32>} : memref<8x128xbf16, #tpu.memory_space<vmem>>, vector<8x16xbf16>,
    %cst_31 = arith.constant 0.000000e+00 : bf16
    %58 = vector.broadcast %cst_31 : bf16 to vector<8x16xbf16>
    %c0_32 = arith.constant 0 : index
    %c112_33 = arith.constant 112 : index
    %59 = vector.load %arg5[%c0_32, %c112_33] : memref<8x128xbf16, #tpu.memory_space<vmem>>, vector<8x16xbf16>
    tpu.vector_store %arg5[%c0_32, %c112_33], %58 {strides = array<i32>} : memref<8x128xbf16, #tpu.memory_space<vmem>>, vector<8x16xbf16>,
    return
  }
  func.func @transform_0(%arg0: i32) -> (i32, i32) {
    %c0_i32 = arith.constant 0 : i32
    %c0_i32_0 = arith.constant 0 : i32
    return %arg0, %c0_i32 : i32, i32
  }
  func.func @transform_1(%arg0: i32) -> (i32, i32) {
    %c0_i32 = arith.constant 0 : i32
    %c0_i32_0 = arith.constant 0 : i32
    return %arg0, %c0_i32 : i32, i32
  }
  func.func @transform_2(%arg0: i32) -> (i32, i32) {
    %c0_i32 = arith.constant 0 : i32
    %c0_i32_0 = arith.constant 0 : i32
    %c0_i32_1 = arith.constant 0 : i32
    return %c0_i32, %c0_i32_0 : i32, i32
  }
  func.func @transform_3(%arg0: i32) -> (i32, i32) {
    %c0_i32 = arith.constant 0 : i32
    %c0_i32_0 = arith.constant 0 : i32
    %c0_i32_1 = arith.constant 0 : i32
    return %c0_i32, %c0_i32_0 : i32, i32
  }
  func.func @transform_4(%arg0: i32) -> (i32, i32) {
    %c0_i32 = arith.constant 0 : i32
    %c0_i32_0 = arith.constant 0 : i32
    return %arg0, %c0_i32 : i32, i32
  }
}

</mosaic_0001>

<bundles_post_ra>
// kernel: _vae_forward_impl.1
= control target key start
LH: loop header
LB: loop body
LE: loop exit
PB: predicated region body
PF: predicated region fallthrough
CT: control target
= control target key end

     0   :  { %v496_v0 = vmov 0.0   ;;  %vm497_vm0 = vmmov 0   ;;  %vm56_vm1 = vcmask 523264   ;;  %vm123_vm2 = vcmask 261120   ;;  %s498_s12 = smov 80   ;;  %s499_s13 = smov 112   ;;  %s617_s2 = inlined_call_operand.vmem [shape: bf16[160,64], index: 2, kind: input, shape index: {}]   ;;  %s618_s0 = inlined_call_operand.vmem [shape: bf16[8,64], index: 0, kind: input, shape index: {}]   ;;  %s619_s3 = inlined_call_operand.vmem [shape: f32[8,64], index: 3, kind: input, shape index: {}]   ;;  %s620_s1 = inlined_call_operand.vmem [shape: bf16[8,16], index: 1, kind: input, shape index: {}]   ;;  %s621_s4 = inlined_call_operand.vmem [shape: bf16[8,128], index: 4, kind: output, shape index: {}]  }
   0x1   :  { %434 = vmatprep.subr.bf16.mxu0 %v496_v0  ;;  %v480_v1 = vld [vmem:[%s617_s2 + $0x18] sm:$0xff]   ;;  %442 = vmatprep.mubr.msk.bf16.mxu0 %vm497_vm0, %v496_v0  ;;  %v481_v2 = vld [vmem:[%s617_s2 + $0x10] sm:$0xff]   ;;  %v482_v3 = vld [vmem:[%s617_s2 + $0x8] sm:$0xff]   ;;  %vm182_vm3 = vcmask 130048   ;;  %s500_s18 = smov 64   ;;  %vm367_vm4 = vcmask 519168  }
   0x2   :  { %446 = vmatprep.subr.bf16.mxu1 %v496_v0  ;;  %450 = vmatprep.mubr.msk.bf16.mxu1 %vm497_vm0, %v496_v0  ;;  %v483_v4 = vld [vmem:[%s617_s2] sm:$0xff]   ;;  %v484_v6 = vld [vmem:[%s617_s2 + $0x28] sm:$0xff]   ;;  %v486_v14 = vld [vmem:[%s617_s2 + $0x30] sm:$0xff]   ;;  %vm375_vm5 = vcmask 650752   ;;  %vm384_vm6 = vcmask 781952   ;;  %vm386_vm7 = vcmask 913152  }
   0x3   :  { %435 = vmatpush3.bf16.msra.mxu0 %v480_v1  ;;  %v18_v5 = vld [vmem:[%s618_s0] sm:$0xf]  ;;  %447 = vmatpush3.bf16.msra.mxu1 %v484_v6  ;;  %v487_v25 = vld [vmem:[%s617_s2 + $0x38] sm:$0xff]   ;;  %v488_v36 = vld [vmem:[%s617_s2 + $0x48] sm:$0xff]   ;;  %vm388_vm8 = vcmask 1044352   ;;  %v501_v1 = vmov 0  }
   0x4   :  { %436 = vmatprep.subr.bf16.mxu0 %v496_v0  ;;  %448 = vmatprep.subr.bf16.mxu1 %v496_v0  ;;  %v485_v7 = vld [vmem:[%s617_s2 + $0x20] sm:$0xff]  }
   0x5   :  { %v394_v8 = vld [vmem:[%s619_s3] ss:$0 sm:$0xff]  ;;  %v400_v17 = vld [vmem:[%s619_s3 + $0x1] ss:$0 sm:$0xff]  ;;  %v404_v26 = vld [vmem:[%s619_s3 + $0x2] ss:$0 sm:$0xff] }
   0x6   :  { %v226_v37 = vld [vmem:[%s620_s1] sm:$0xf]  ;;  %v410_v52 = vld [vmem:[%s619_s3 + $0x4] ss:$0 sm:$0xff] }
   0x7   :  { %437 = vmatpush3.bf16.msra.mxu0 %v481_v2  ;;  %449 = vmatpush3.bf16.msra.mxu1 %v485_v7  ;;  %v227_v38 = vunpack.c.l.bf16 %v226_v37  ;;  %v489_v43 = vld [vmem:[%s617_s2 + $0x40] sm:$0xff]  }
   0x8   :  { %438 = vmatprep.subr.bf16.mxu0 %v496_v0  ;;  %454 = vmatprep.subr.bf16.mxu1 %v496_v0  ;;  %v407_v44 = vld [vmem:[%s619_s3 + $0x3] ss:$0 sm:$0xff] }
   0xb   :  { %439 = vmatpush3.bf16.msra.mxu0 %v482_v3 }
   0xc   :  { %440 = vmatprep.subr.bf16.mxu0 %v496_v0 }
   0xf   :  { %441 = vmatpush3.bf16.msra.mxu0 %v483_v4 }
  0x10   :  { %460 = vmatprep.subr.bf16.mxu0 %v496_v0 }
  0x12   :  { %443 = vmatmul.mubr.msk.bf16.vlgmr.msra.gmra.mxu0 %vm56_vm1, %v18_v5 }
  0x13   :  { %462 = vmatprep.mubr.msk.bf16.mxu0 %vm497_vm0, %v496_v0  ;;  %461 = vmatpush3.bf16.msra.mxu0 %v487_v25 }
  0xd2   :  { %v94_v9 = vpop.f32.mrf.mxu0 }
  0xd3   :  { %v95_v10 = vadd.f32 %v394_v8, %v94_v9 }
  0xd4   :  { %v444_v11 = vpop.f32.mrf.mxu0 }
  0xd5   :  { %v100_v12 = vmax.f32 %v95_v10, 0.0 }
  0xd6   :  { %v97_v13 = vpop.f32.mrf.mxu0 }
  0xd7   :  { %v101_v15 = vpack.c.bf16 %v100_v12, %v100_v12 }
  0xd8   :  { %v445_v16 = vpop.f32.mrf.mxu0 }
  0xd9   :  { %451 = vmatmul.mubr.msk.bf16.vlgmr.msra.gmra.mxu1 %vm123_vm2, %v101_v15 }
  0xda   :  { %455 = vmatpush3.bf16.msra.mxu1 %v486_v14  ;;  %456 = vmatprep.mubr.msk.bf16.mxu1 %vm497_vm0, %v496_v0 }
  0xdb   :  { %466 = vmatprep.subr.bf16.mxu1 %v496_v0 }
 0x199   :  { %v161_v18 = vpop.f32.mrf.mxu1 }
 0x19a   :  { %v162_v19 = vadd.f32 %v400_v17, %v161_v18 }
 0x19b   :  { %v452_v20 = vpop.f32.mrf.mxu1 }
 0x19c   :  { %v167_v21 = vmax.f32 %v162_v19, 0.0 }
 0x19d   :  { %v164_v22 = vpop.f32.mrf.mxu1 }
 0x19e   :  { %v168_v23 = vpack.c.bf16 %v167_v21, %v167_v21 }
 0x19f   :  { %v453_v24 = vpop.f32.mrf.mxu1 }
 0x1a0   :  { %457 = vmatmul.mubr.msk.bf16.vlgmr.msra.gmra.mxu1 %vm182_vm3, %v168_v23 }
 0x1a1   :  { %470 = vmatprep.mubr.msk.bf16.mxu1 %vm497_vm0, %v496_v0  ;;  %467 = vmatpush3.bf16.msra.mxu1 %v488_v36 }
 0x1a2   :  { %468 = vmatprep.subr.bf16.mxu1 %v496_v0 }
 0x1a5   :  { %469 = vmatpush3.bf16.msra.mxu1 %v489_v43 }
 0x260   :  { %v220_v27 = vpop.f32.mrf.mxu1 }
 0x261   :  { %v221_v28 = vadd.f32 %v404_v26, %v220_v27 }
 0x262   :  { %v458_v29 = vpop.f32.mrf.mxu1 }
 0x263   :  { %v228_v30 = vmul.f32 0.5, %v221_v28  ;;  %v418_v31 = vpack.c.bf16 %v221_v28, %v221_v28 }
 0x264   :  { %v223_v32 = vpop.f32.mrf.mxu1 }
 0x265   :  { %v229_v33 = vmul.f32 1.442695, %v228_v30  ;;  %381 = vrot.lane.b32.xlu1 %v418_v31, %s498_s12 }
 0x266   :  { %v459_v34 = vpop.f32.mrf.mxu1 }
 0x267   :  { %490 = vpow2.f32 %v229_v33 }
 0x274   :  { %v491_v35 = vpop.eup %490 }
 0x275   :  { %232 = vrot.lane.b32.xlu0 %v491_v35, %s499_s13 }
 0x2d7   :  { %v382_v0 = vpop.permute.xlu1 %381 }
 0x2e7   :  { %v233_v39 = vpop.permute.xlu0 %232 }
 0x2e8   :  { %v235_v40 = vmul.f32 %v233_v39, %v227_v38 }
 0x2ea   :  { %v236_v41 = vadd.f32 %v235_v40, %v221_v28 }
 0x2ec   :  { %v237_v42 = vpack.c.bf16 %v236_v41, %v236_v41 }
 0x2ee   :  { %372 = vrot.lane.b32.xlu0 %v237_v42, %s500_s18  ;;  %463 = vmatmul.mubr.msk.bf16.vlgmr.msra.gmra.mxu0 %vm182_vm3, %v237_v42 }
 0x360   :  { %v373_v63 = vpop.permute.xlu0 %372 }
 0x3ae   :  { %v288_v45 = vpop.f32.mrf.mxu0 }
 0x3af   :  { %v289_v46 = vadd.f32 %v407_v44, %v288_v45 }
 0x3b0   :  { %v464_v47 = vpop.f32.mrf.mxu0 }
 0x3b1   :  { %v294_v48 = vmax.f32 %v289_v46, 0.0 }
 0x3b2   :  { %v291_v49 = vpop.f32.mrf.mxu0 }
 0x3b3   :  { %v295_v50 = vpack.c.bf16 %v294_v48, %v294_v48 }
 0x3b4   :  { %v465_v51 = vpop.f32.mrf.mxu0 }
 0x3b5   :  { %471 = vmatmul.mubr.msk.bf16.vlgmr.msra.gmra.mxu1 %vm123_vm2, %v295_v50 }
 0x475   :  { %v354_v53 = vpop.f32.mrf.mxu1 }
 0x476   :  { %v355_v54 = vadd.f32 %v410_v52, %v354_v53 }
 0x477   :  { %v472_v55 = vpop.f32.mrf.mxu1 }
 0x478   :  { %v414_v56 = vmul.f32 -1.442695, %v355_v54 }
 0x479   :  { %v357_v57 = vpop.f32.mrf.mxu1 }
 0x47a   :  { %492 = vpow2.f32 %v414_v56 }
 0x47b   :  { %v473_v58 = vpop.f32.mrf.mxu1 }
 0x487   :  { %v493_v59 = vpop.eup %492 }
 0x488   :  { %v363_v60 = vadd.f32 1.0, %v493_v59 }
 0x48a   :  { %494 = vrcp.f32 %v363_v60 }
 0x497   :  { %v495_v61 = vpop.eup %494 }
 0x498   :  { %v366_v62 = vpack.c.bf16 %v495_v61, %v495_v61 }
 0x49a   :  { %368 = vst.msk [vmem:[%s621_s4] sm:$0xf] %vm367_vm4, %v366_v62 }
 0x49b   :  { %376 = vst.msk [vmem:[%s621_s4] sm:$0xf] %vm375_vm5, %v373_v63 }
 0x49c   :  { %385 = vst.msk [vmem:[%s621_s4] sm:$0xf] %vm384_vm6, %v382_v0 }
 0x49d   :  { %387 = vst.msk [vmem:[%s621_s4] sm:$0xf] %vm386_vm7, %v382_v0 }
 0x49e   :  { %389 = vst.msk [vmem:[%s621_s4] sm:$0xf] %vm388_vm8, %v501_v1 }

</bundles_post_ra>
